<compile_context>
chip_gen: v6e
topology: v6e:2x2x1
jax: 0.10.0
libtpu: 0.0.40
codegen_flags: <defaults>
</compile_context>

<pallas_src>
import jax
import jax.numpy as jnp
from jax.experimental import pallas as pl
from jax.experimental.pallas import tpu as pltpu


def _round_up(x, m):
    return (x + m - 1) // m * m


def _largest_divisor_leq(n, cap):
    for d in range(min(n, cap), 0, -1):
        if n % d == 0:
            return d
    return 1


def _reorder_gates(w):
    """Reorder the 4H gate axis from PyTorch [i, f, g, o] to [i, f, o, g]."""
    H = w.shape[-1] // 4
    return jnp.concatenate(
        [w[..., :2 * H], w[..., 3 * H:], w[..., 2 * H:3 * H]], axis=-1)


def lstm_recurrence_kernel(xp_ref, whh_ref, wlin_ref, blin_ref, out_ref,
                           h_sc, c_sc):
    """Runs T_BLK LSTM steps; h/c carried in VMEM scratch across the time axis.

    xp_ref  : (T_BLK, B_BLK, 4H) bf16 -- precomputed x@W_ih^T + bias, order [i,f,o,g]
    whh_ref : (H, 4H)            bf16 -- recurrent weights, same gate order
    wlin_ref: (H, out)           bf16
    blin_ref: (1, out)           f32
    out_ref : (B_BLK, out)       f32  -- written only on the last time block
    """
    tb = pl.program_id(1)

    @pl.when(tb == 0)
    def _():
        h_sc[...] = jnp.zeros_like(h_sc)
        c_sc[...] = jnp.zeros_like(c_sc)

    H = whh_ref.shape[0]
    t_blk = xp_ref.shape[0]

    # Unrolled inner time loop: only the unavoidably serial h @ W_hh^T matmul
    # and the gate math remain per step (x-projection + bias already folded in).
    for t in range(t_blk):
        gates = xp_ref[t].astype(jnp.float32) + jnp.dot(
            h_sc[...].astype(jnp.bfloat16), whh_ref[...],
            preferred_element_type=jnp.float32)
        sig = jax.nn.sigmoid(gates[:, :3 * H])     # [i | f | o] in one EUP slab
        i_g = sig[:, 0 * H:1 * H]
        f_g = sig[:, 1 * H:2 * H]
        o_g = sig[:, 2 * H:3 * H]
        g_g = jnp.tanh(gates[:, 3 * H:4 * H])
        c_new = f_g * c_sc[...] + i_g * g_g
        h_sc[...] = o_g * jnp.tanh(c_new)
        c_sc[...] = c_new

    @pl.when(tb == pl.num_programs(1) - 1)
    def _():
        # Fused final Linear on the last hidden state.
        out_ref[...] = (jnp.dot(h_sc[...].astype(jnp.bfloat16), wlin_ref[...],
                                preferred_element_type=jnp.float32)
                        + blin_ref[...])


def lstm_tbptt_forward(seq, params, *, t_blk_cap=32):
    """seq: (seq_len, bs) int32 token ids. Returns (bs, output_dim) f32 logits."""
    emb_w = params["embed"]          # (vocab, E)  f32
    wih_t = params["wih_t"]          # (E, 4H)     PyTorch W_ih transposed
    whh_t = params["whh_t"]          # (H, 4H)
    bias = params["bias"]            # (1, 4H)  == b_ih + b_hh
    wlin_t = params["wlin_t"]        # (H, out)
    blin = params["blin"]            # (1, out)

    seq_len, bs = seq.shape
    H = whh_t.shape[0]
    out_dim = wlin_t.shape[1]

    # Batch padding / blocking (sublane multiple of 8; >=128 -> 128-wide blocks).
    bs_pad = _round_up(bs, 8)
    if bs_pad > 128:
        bs_pad = _round_up(bs_pad, 128)
    b_blk = min(bs_pad, 128)
    seq_p = seq if bs_pad == bs else jnp.pad(seq, ((0, 0), (0, bs_pad - bs)))

    # Time blocking: T_BLK must divide seq_len (padding time would change h).
    t_blk = _largest_divisor_leq(seq_len, t_blk_cap)

    # Static gate reorder + bf16 weights.
    wih_r = _reorder_gates(wih_t).astype(jnp.bfloat16)
    whh_r = _reorder_gates(whh_t).astype(jnp.bfloat16)
    bias_r = _reorder_gates(bias)
    wlin_b = wlin_t.astype(jnp.bfloat16)

    # Glue: embedding gather.
    # TODO(synk): nn.Dropout(0.1) is stochastic in training; eval-mode identity here.
    # TODO(synk): persistent TBPTT rnn_state across calls not carried; starts at zeros.
    x = jnp.take(emb_w, seq_p, axis=0).astype(jnp.bfloat16)       # (T, Bp, E)

    # Hoisted input projection: one big MXU matmul over all timesteps, bias folded.
    x_proj = (jnp.einsum("tbe,ef->tbf", x, wih_r,
                         preferred_element_type=jnp.float32)
              + bias_r).astype(jnp.bfloat16)                      # (T, Bp, 4H)

    grid = (bs_pad // b_blk, seq_len // t_blk)

    grid_spec = pltpu.PrefetchScalarGridSpec(
        num_scalar_prefetch=0,
        grid=grid,
        in_specs=[
            pl.BlockSpec((t_blk, b_blk, 4 * H), lambda b, t: (t, b, 0)),
            pl.BlockSpec((H, 4 * H), lambda b, t: (0, 0)),
            pl.BlockSpec((H, out_dim), lambda b, t: (0, 0)),
            pl.BlockSpec((1, out_dim), lambda b, t: (0, 0)),
        ],
        out_specs=pl.BlockSpec((b_blk, out_dim), lambda b, t: (b, 0)),
        scratch_shapes=[
            pltpu.VMEM((b_blk, H), jnp.float32),   # h
            pltpu.VMEM((b_blk, H), jnp.float32),   # c
        ],
    )

    cost = pl.CostEstimate(
        flops=2 * seq_len * bs_pad * H * 4 * H + 2 * bs_pad * H * out_dim,
        transcendentals=seq_len * bs_pad * 5 * H,
        bytes_accessed=(x_proj.size * 2 + whh_r.size * 2 + wlin_b.size * 2
                        + blin.size * 4 + bs_pad * out_dim * 4),
    )

    out_pad = pl.pallas_call(
        lstm_recurrence_kernel,
        out_shape=jax.ShapeDtypeStruct((bs_pad, out_dim), jnp.float32),
        grid_spec=grid_spec,
        compiler_params=pltpu.CompilerParams(
            dimension_semantics=("parallel", "arbitrary"),
            vmem_limit_bytes=64 * 1024 * 1024),
        cost_estimate=cost,
    )(x_proj, whh_r, wlin_b, blin)

    return out_pad[:bs]


def reference_forward(seq, params):
    """Pure-JAX reference with the same numeric recipe (bf16 matmuls, f32 acc,
    f32 gate math), PyTorch gate order, lax.scan recurrence."""
    emb_w = params["embed"]
    wih = params["wih_t"].astype(jnp.bfloat16)
    whh = params["whh_t"].astype(jnp.bfloat16)
    wlin = params["wlin_t"].astype(jnp.bfloat16)
    H = params["whh_t"].shape[0]
    bs = seq.shape[1]

    x = jnp.take(emb_w, seq, axis=0).astype(jnp.bfloat16)
    x_proj = (jnp.einsum("tbe,ef->tbf", x, wih,
                         preferred_element_type=jnp.float32)
              + params["bias"]).astype(jnp.bfloat16)

    def step(carry, xp_t):
        h, c = carry
        gates = xp_t.astype(jnp.float32) + jnp.dot(
            h.astype(jnp.bfloat16), whh, preferred_element_type=jnp.float32)
        i_g = jax.nn.sigmoid(gates[:, 0 * H:1 * H])
        f_g = jax.nn.sigmoid(gates[:, 1 * H:2 * H])
        g_g = jnp.tanh(gates[:, 2 * H:3 * H])
        o_g = jax.nn.sigmoid(gates[:, 3 * H:4 * H])
        c_new = f_g * c + i_g * g_g
        h_new = o_g * jnp.tanh(c_new)
        return (h_new, c_new), None

    h0 = jnp.zeros((bs, H), jnp.float32)
    c0 = jnp.zeros((bs, H), jnp.float32)
    (h_last, _), _ = jax.lax.scan(step, (h0, c0), x_proj)
    return jnp.dot(h_last.astype(jnp.bfloat16), wlin,
                   preferred_element_type=jnp.float32) + params["blin"]


def init_params(key, vocab_size, embed_size, hidden_size, output_dim):
    ks = jax.random.split(key, 7)
    H = hidden_size
    return {
        "embed": 0.1 * jax.random.normal(ks[0], (vocab_size, embed_size), jnp.float32),
        # PyTorch LSTM stores W_ih (4H, E), W_hh (4H, H); we keep transposes.
        "wih_t": 0.1 * jax.random.normal(ks[1], (embed_size, 4 * H), jnp.float32),
        "whh_t": 0.1 * jax.random.normal(ks[2], (H, 4 * H), jnp.float32),
        # bias = b_ih + b_hh (summed; equivalent in the forward pass)
        "bias": (0.1 * jax.random.normal(ks[3], (1, 4 * H), jnp.float32)
                 + 0.1 * jax.random.normal(ks[4], (1, 4 * H), jnp.float32)),
        "wlin_t": 0.1 * jax.random.normal(ks[5], (H, output_dim), jnp.float32),
        "blin": 0.1 * jax.random.normal(ks[6], (1, output_dim), jnp.float32),
    }


if __name__ == "__main__":
    vocab_size, embed_size, hidden_size, output_dim = 100, 16, 32, 2
    seq_len, bs = 8, 4

    key = jax.random.PRNGKey(0)
    pkey, skey = jax.random.split(key)
    params = init_params(pkey, vocab_size, embed_size, hidden_size, output_dim)
    seq = jax.random.randint(skey, (seq_len, bs), 0, vocab_size, dtype=jnp.int32)

    out = jax.block_until_ready(lstm_tbptt_forward(seq, params))
    ref = jax.block_until_ready(reference_forward(seq, params))

    assert out.shape == (bs, output_dim)
    assert jnp.allclose(out, ref, atol=1e-3, rtol=1e-3), (out, ref)
    print("KERNEL_OK")
</pallas_src>

<mosaic_0001>
module attributes {stable_mosaic.version = 11 : i64} {
  func.func @lstm_recurrence_kernel(%arg0: i32, %arg1: i32, %arg2: memref<8x8x128xbf16, #tpu.memory_space<vmem>>, %arg3: memref<32x128xbf16, #tpu.memory_space<vmem>>, %arg4: memref<32x2xbf16, #tpu.memory_space<vmem>>, %arg5: memref<1x2xf32, #tpu.memory_space<vmem>>, %arg6: memref<8x2xf32, #tpu.memory_space<vmem>>, %arg7: memref<8x32xf32, #tpu.memory_space<vmem>>, %arg8: memref<8x32xf32, #tpu.memory_space<vmem>>) attributes {dimension_semantics = [#tpu.dimension_semantics<parallel>, #tpu.dimension_semantics<arbitrary>], iteration_bounds = array<i64: 1, 1>, scalar_prefetch = 0 : i64, scratch_operands = 2 : i64, tpu.core_type = #tpu.core_type<tc>, window_params = [{transform_indices = @transform_0, window_bounds = array<i64: 8, 8, 128>}, {pipeline_mode = #tpu.pipeline_mode<synchronous>, transform_indices = @transform_1, window_bounds = array<i64: 32, 128>}, {pipeline_mode = #tpu.pipeline_mode<synchronous>, transform_indices = @transform_2, window_bounds = array<i64: 32, 2>}, {pipeline_mode = #tpu.pipeline_mode<synchronous>, transform_indices = @transform_3, window_bounds = array<i64: 1, 2>}, {transform_indices = @transform_4, window_bounds = array<i64: 8, 2>}]} {
    %c0_i32 = arith.constant 0 : i32
    %0 = arith.cmpi eq, %arg1, %c0_i32 : i32
    %1 = arith.extui %0 : i1 to i32
    %c0_i32_0 = arith.constant 0 : i32
    %2 = arith.cmpi ne, %1, %c0_i32_0 : i32
    scf.if %2 {
      %cst_114 = arith.constant 0.000000e+00 : f32
      %222 = vector.broadcast %cst_114 : f32 to vector<8x32xf32>
      %c0_115 = arith.constant 0 : index
      %c0_116 = arith.constant 0 : index
      %223 = vector.load %arg7[%c0_115, %c0_116] : memref<8x32xf32, #tpu.memory_space<vmem>>, vector<8x32xf32>
      tpu.vector_store %arg7[%c0_115, %c0_116], %222 {strides = array<i32>} : memref<8x32xf32, #tpu.memory_space<vmem>>, vector<8x32xf32>,
      %cst_117 = arith.constant 0.000000e+00 : f32
      %224 = vector.broadcast %cst_117 : f32 to vector<8x32xf32>
      %c0_118 = arith.constant 0 : index
      %c0_119 = arith.constant 0 : index
      %225 = vector.load %arg8[%c0_118, %c0_119] : memref<8x32xf32, #tpu.memory_space<vmem>>, vector<8x32xf32>
      tpu.vector_store %arg8[%c0_118, %c0_119], %224 {strides = array<i32>} : memref<8x32xf32, #tpu.memory_space<vmem>>, vector<8x32xf32>,
    } else {
    }
    %c0 = arith.constant 0 : index
    %c0_1 = arith.constant 0 : index
    %c0_2 = arith.constant 0 : index
    %3 = vector.load %arg2[%c0, %c0_1, %c0_2] : memref<8x8x128xbf16, #tpu.memory_space<vmem>>, vector<1x8x128xbf16>
    %4 = vector.shape_cast %3 : vector<1x8x128xbf16> to vector<8x128xbf16>
    %5 = arith.extf %4 : vector<8x128xbf16> to vector<8x128xf32>
    %c0_3 = arith.constant 0 : index
    %c0_4 = arith.constant 0 : index
    %6 = vector.load %arg7[%c0_3, %c0_4] : memref<8x32xf32, #tpu.memory_space<vmem>>, vector<8x32xf32>
    %7 = arith.truncf %6 : vector<8x32xf32> to vector<8x32xbf16>
    %c0_5 = arith.constant 0 : index
    %c0_6 = arith.constant 0 : index
    %8 = vector.load %arg3[%c0_5, %c0_6] : memref<32x128xbf16, #tpu.memory_space<vmem>>, vector<32x128xbf16>
    %cst = arith.constant dense<0.000000e+00> : vector<8x128xf32>
    %9 = tpu.matmul %7, %8, %cst {dimension_numbers = #tpu.dot_dimension_numbers<[1], [0], [0], [1], [0, 0, 1, 1], [], []>} : vector<8x32xbf16>, vector<32x128xbf16>, vector<8x128xf32> -> vector<8x128xf32>
    %10 = arith.addf %5, %9 : vector<8x128xf32>
    %11 = vector.extract_strided_slice %10 {offsets = [0, 0], sizes = [8, 96], strides = [1, 1]} : vector<8x128xf32> to vector<8x96xf32>
    %12 = arith.negf %11 : vector<8x96xf32>
    %13 = math.exp %12 : vector<8x96xf32>
    %cst_7 = arith.constant 1.000000e+00 : f32
    %14 = vector.broadcast %cst_7 : f32 to vector<8x96xf32>
    %15 = arith.addf %14, %13 : vector<8x96xf32>
    %16 = arith.divf %14, %15 : vector<8x96xf32>
    %17 = vector.extract_strided_slice %16 {offsets = [0, 0], sizes = [8, 32], strides = [1, 1]} : vector<8x96xf32> to vector<8x32xf32>
    %18 = vector.extract_strided_slice %16 {offsets = [0, 32], sizes = [8, 32], strides = [1, 1]} : vector<8x96xf32> to vector<8x32xf32>
    %19 = vector.extract_strided_slice %16 {offsets = [0, 64], sizes = [8, 32], strides = [1, 1]} : vector<8x96xf32> to vector<8x32xf32>
    %20 = vector.extract_strided_slice %10 {offsets = [0, 96], sizes = [8, 32], strides = [1, 1]} : vector<8x128xf32> to vector<8x32xf32>
    %21 = math.tanh %20 : vector<8x32xf32>
    %c0_8 = arith.constant 0 : index
    %c0_9 = arith.constant 0 : index
    %22 = vector.load %arg8[%c0_8, %c0_9] : memref<8x32xf32, #tpu.memory_space<vmem>>, vector<8x32xf32>
    %23 = arith.mulf %18, %22 : vector<8x32xf32>
    %24 = arith.mulf %17, %21 : vector<8x32xf32>
    %25 = arith.addf %23, %24 : vector<8x32xf32>
    %26 = math.tanh %25 : vector<8x32xf32>
    %27 = arith.mulf %19, %26 : vector<8x32xf32>
    %c0_10 = arith.constant 0 : index
    %c0_11 = arith.constant 0 : index
    %28 = vector.load %arg7[%c0_10, %c0_11] : memref<8x32xf32, #tpu.memory_space<vmem>>, vector<8x32xf32>
    tpu.vector_store %arg7[%c0_10, %c0_11], %27 {strides = array<i32>} : memref<8x32xf32, #tpu.memory_space<vmem>>, vector<8x32xf32>,
    %c0_12 = arith.constant 0 : index
    %c0_13 = arith.constant 0 : index
    %29 = vector.load %arg8[%c0_12, %c0_13] : memref<8x32xf32, #tpu.memory_space<vmem>>, vector<8x32xf32>
    tpu.vector_store %arg8[%c0_12, %c0_13], %25 {strides = array<i32>} : memref<8x32xf32, #tpu.memory_space<vmem>>, vector<8x32xf32>,
    %c1 = arith.constant 1 : index
    %c0_14 = arith.constant 0 : index
    %c0_15 = arith.constant 0 : index
    %30 = vector.load %arg2[%c1, %c0_14, %c0_15] : memref<8x8x128xbf16, #tpu.memory_space<vmem>>, vector<1x8x128xbf16>
    %31 = vector.shape_cast %30 : vector<1x8x128xbf16> to vector<8x128xbf16>
    %32 = arith.extf %31 : vector<8x128xbf16> to vector<8x128xf32>
    %c0_16 = arith.constant 0 : index
    %c0_17 = arith.constant 0 : index
    %33 = vector.load %arg7[%c0_16, %c0_17] : memref<8x32xf32, #tpu.memory_space<vmem>>, vector<8x32xf32>
    %34 = arith.truncf %33 : vector<8x32xf32> to vector<8x32xbf16>
    %c0_18 = arith.constant 0 : index
    %c0_19 = arith.constant 0 : index
    %35 = vector.load %arg3[%c0_18, %c0_19] : memref<32x128xbf16, #tpu.memory_space<vmem>>, vector<32x128xbf16>
    %cst_20 = arith.constant dense<0.000000e+00> : vector<8x128xf32>
    %36 = tpu.matmul %34, %35, %cst_20 {dimension_numbers = #tpu.dot_dimension_numbers<[1], [0], [0], [1], [0, 0, 1, 1], [], []>} : vector<8x32xbf16>, vector<32x128xbf16>, vector<8x128xf32> -> vector<8x128xf32>
    %37 = arith.addf %32, %36 : vector<8x128xf32>
    %38 = vector.extract_strided_slice %37 {offsets = [0, 0], sizes = [8, 96], strides = [1, 1]} : vector<8x128xf32> to vector<8x96xf32>
    %39 = arith.negf %38 : vector<8x96xf32>
    %40 = math.exp %39 : vector<8x96xf32>
    %cst_21 = arith.constant 1.000000e+00 : f32
    %41 = vector.broadcast %cst_21 : f32 to vector<8x96xf32>
    %42 = arith.addf %41, %40 : vector<8x96xf32>
    %43 = arith.divf %41, %42 : vector<8x96xf32>
    %44 = vector.extract_strided_slice %43 {offsets = [0, 0], sizes = [8, 32], strides = [1, 1]} : vector<8x96xf32> to vector<8x32xf32>
    %45 = vector.extract_strided_slice %43 {offsets = [0, 32], sizes = [8, 32], strides = [1, 1]} : vector<8x96xf32> to vector<8x32xf32>
    %46 = vector.extract_strided_slice %43 {offsets = [0, 64], sizes = [8, 32], strides = [1, 1]} : vector<8x96xf32> to vector<8x32xf32>
    %47 = vector.extract_strided_slice %37 {offsets = [0, 96], sizes = [8, 32], strides = [1, 1]} : vector<8x128xf32> to vector<8x32xf32>
    %48 = math.tanh %47 : vector<8x32xf32>
    %c0_22 = arith.constant 0 : index
    %c0_23 = arith.constant 0 : index
    %49 = vector.load %arg8[%c0_22, %c0_23] : memref<8x32xf32, #tpu.memory_space<vmem>>, vector<8x32xf32>
    %50 = arith.mulf %45, %49 : vector<8x32xf32>
    %51 = arith.mulf %44, %48 : vector<8x32xf32>
    %52 = arith.addf %50, %51 : vector<8x32xf32>
    %53 = math.tanh %52 : vector<8x32xf32>
    %54 = arith.mulf %46, %53 : vector<8x32xf32>
    %c0_24 = arith.constant 0 : index
    %c0_25 = arith.constant 0 : index
    %55 = vector.load %arg7[%c0_24, %c0_25] : memref<8x32xf32, #tpu.memory_space<vmem>>, vector<8x32xf32>
    tpu.vector_store %arg7[%c0_24, %c0_25], %54 {strides = array<i32>} : memref<8x32xf32, #tpu.memory_space<vmem>>, vector<8x32xf32>,
    %c0_26 = arith.constant 0 : index
    %c0_27 = arith.constant 0 : index
    %56 = vector.load %arg8[%c0_26, %c0_27] : memref<8x32xf32, #tpu.memory_space<vmem>>, vector<8x32xf32>
    tpu.vector_store %arg8[%c0_26, %c0_27], %52 {strides = array<i32>} : memref<8x32xf32, #tpu.memory_space<vmem>>, vector<8x32xf32>,
    %c2 = arith.constant 2 : index
    %c0_28 = arith.constant 0 : index
    %c0_29 = arith.constant 0 : index
    %57 = vector.load %arg2[%c2, %c0_28, %c0_29] : memref<8x8x128xbf16, #tpu.memory_space<vmem>>, vector<1x8x128xbf16>
    %58 = vector.shape_cast %57 : vector<1x8x128xbf16> to vector<8x128xbf16>
    %59 = arith.extf %58 : vector<8x128xbf16> to vector<8x128xf32>
    %c0_30 = arith.constant 0 : index
    %c0_31 = arith.constant 0 : index
    %60 = vector.load %arg7[%c0_30, %c0_31] : memref<8x32xf32, #tpu.memory_space<vmem>>, vector<8x32xf32>
    %61 = arith.truncf %60 : vector<8x32xf32> to vector<8x32xbf16>
    %c0_32 = arith.constant 0 : index
    %c0_33 = arith.constant 0 : index
    %62 = vector.load %arg3[%c0_32, %c0_33] : memref<32x128xbf16, #tpu.memory_space<vmem>>, vector<32x128xbf16>
    %cst_34 = arith.constant dense<0.000000e+00> : vector<8x128xf32>
    %63 = tpu.matmul %61, %62, %cst_34 {dimension_numbers = #tpu.dot_dimension_numbers<[1], [0], [0], [1], [0, 0, 1, 1], [], []>} : vector<8x32xbf16>, vector<32x128xbf16>, vector<8x128xf32> -> vector<8x128xf32>
    %64 = arith.addf %59, %63 : vector<8x128xf32>
    %65 = vector.extract_strided_slice %64 {offsets = [0, 0], sizes = [8, 96], strides = [1, 1]} : vector<8x128xf32> to vector<8x96xf32>
    %66 = arith.negf %65 : vector<8x96xf32>
    %67 = math.exp %66 : vector<8x96xf32>
    %cst_35 = arith.constant 1.000000e+00 : f32
    %68 = vector.broadcast %cst_35 : f32 to vector<8x96xf32>
    %69 = arith.addf %68, %67 : vector<8x96xf32>
    %70 = arith.divf %68, %69 : vector<8x96xf32>
    %71 = vector.extract_strided_slice %70 {offsets = [0, 0], sizes = [8, 32], strides = [1, 1]} : vector<8x96xf32> to vector<8x32xf32>
    %72 = vector.extract_strided_slice %70 {offsets = [0, 32], sizes = [8, 32], strides = [1, 1]} : vector<8x96xf32> to vector<8x32xf32>
    %73 = vector.extract_strided_slice %70 {offsets = [0, 64], sizes = [8, 32], strides = [1, 1]} : vector<8x96xf32> to vector<8x32xf32>
    %74 = vector.extract_strided_slice %64 {offsets = [0, 96], sizes = [8, 32], strides = [1, 1]} : vector<8x128xf32> to vector<8x32xf32>
    %75 = math.tanh %74 : vector<8x32xf32>
    %c0_36 = arith.constant 0 : index
    %c0_37 = arith.constant 0 : index
    %76 = vector.load %arg8[%c0_36, %c0_37] : memref<8x32xf32, #tpu.memory_space<vmem>>, vector<8x32xf32>
    %77 = arith.mulf %72, %76 : vector<8x32xf32>
    %78 = arith.mulf %71, %75 : vector<8x32xf32>
    %79 = arith.addf %77, %78 : vector<8x32xf32>
    %80 = math.tanh %79 : vector<8x32xf32>
    %81 = arith.mulf %73, %80 : vector<8x32xf32>
    %c0_38 = arith.constant 0 : index
    %c0_39 = arith.constant 0 : index
    %82 = vector.load %arg7[%c0_38, %c0_39] : memref<8x32xf32, #tpu.memory_space<vmem>>, vector<8x32xf32>
    tpu.vector_store %arg7[%c0_38, %c0_39], %81 {strides = array<i32>} : memref<8x32xf32, #tpu.memory_space<vmem>>, vector<8x32xf32>,
    %c0_40 = arith.constant 0 : index
    %c0_41 = arith.constant 0 : index
    %83 = vector.load %arg8[%c0_40, %c0_41] : memref<8x32xf32, #tpu.memory_space<vmem>>, vector<8x32xf32>
    tpu.vector_store %arg8[%c0_40, %c0_41], %79 {strides = array<i32>} : memref<8x32xf32, #tpu.memory_space<vmem>>, vector<8x32xf32>,
    %c3 = arith.constant 3 : index
    %c0_42 = arith.constant 0 : index
    %c0_43 = arith.constant 0 : index
    %84 = vector.load %arg2[%c3, %c0_42, %c0_43] : memref<8x8x128xbf16, #tpu.memory_space<vmem>>, vector<1x8x128xbf16>
    %85 = vector.shape_cast %84 : vector<1x8x128xbf16> to vector<8x128xbf16>
    %86 = arith.extf %85 : vector<8x128xbf16> to vector<8x128xf32>
    %c0_44 = arith.constant 0 : index
    %c0_45 = arith.constant 0 : index
    %87 = vector.load %arg7[%c0_44, %c0_45] : memref<8x32xf32, #tpu.memory_space<vmem>>, vector<8x32xf32>
    %88 = arith.truncf %87 : vector<8x32xf32> to vector<8x32xbf16>
    %c0_46 = arith.constant 0 : index
    %c0_47 = arith.constant 0 : index
    %89 = vector.load %arg3[%c0_46, %c0_47] : memref<32x128xbf16, #tpu.memory_space<vmem>>, vector<32x128xbf16>
    %cst_48 = arith.constant dense<0.000000e+00> : vector<8x128xf32>
    %90 = tpu.matmul %88, %89, %cst_48 {dimension_numbers = #tpu.dot_dimension_numbers<[1], [0], [0], [1], [0, 0, 1, 1], [], []>} : vector<8x32xbf16>, vector<32x128xbf16>, vector<8x128xf32> -> vector<8x128xf32>
    %91 = arith.addf %86, %90 : vector<8x128xf32>
    %92 = vector.extract_strided_slice %91 {offsets = [0, 0], sizes = [8, 96], strides = [1, 1]} : vector<8x128xf32> to vector<8x96xf32>
    %93 = arith.negf %92 : vector<8x96xf32>
    %94 = math.exp %93 : vector<8x96xf32>
    %cst_49 = arith.constant 1.000000e+00 : f32
    %95 = vector.broadcast %cst_49 : f32 to vector<8x96xf32>
    %96 = arith.addf %95, %94 : vector<8x96xf32>
    %97 = arith.divf %95, %96 : vector<8x96xf32>
    %98 = vector.extract_strided_slice %97 {offsets = [0, 0], sizes = [8, 32], strides = [1, 1]} : vector<8x96xf32> to vector<8x32xf32>
    %99 = vector.extract_strided_slice %97 {offsets = [0, 32], sizes = [8, 32], strides = [1, 1]} : vector<8x96xf32> to vector<8x32xf32>
    %100 = vector.extract_strided_slice %97 {offsets = [0, 64], sizes = [8, 32], strides = [1, 1]} : vector<8x96xf32> to vector<8x32xf32>
    %101 = vector.extract_strided_slice %91 {offsets = [0, 96], sizes = [8, 32], strides = [1, 1]} : vector<8x128xf32> to vector<8x32xf32>
    %102 = math.tanh %101 : vector<8x32xf32>
    %c0_50 = arith.constant 0 : index
    %c0_51 = arith.constant 0 : index
    %103 = vector.load %arg8[%c0_50, %c0_51] : memref<8x32xf32, #tpu.memory_space<vmem>>, vector<8x32xf32>
    %104 = arith.mulf %99, %103 : vector<8x32xf32>
    %105 = arith.mulf %98, %102 : vector<8x32xf32>
    %106 = arith.addf %104, %105 : vector<8x32xf32>
    %107 = math.tanh %106 : vector<8x32xf32>
    %108 = arith.mulf %100, %107 : vector<8x32xf32>
    %c0_52 = arith.constant 0 : index
    %c0_53 = arith.constant 0 : index
    %109 = vector.load %arg7[%c0_52, %c0_53] : memref<8x32xf32, #tpu.memory_space<vmem>>, vector<8x32xf32>
    tpu.vector_store %arg7[%c0_52, %c0_53], %108 {strides = array<i32>} : memref<8x32xf32, #tpu.memory_space<vmem>>, vector<8x32xf32>,
    %c0_54 = arith.constant 0 : index
    %c0_55 = arith.constant 0 : index
    %110 = vector.load %arg8[%c0_54, %c0_55] : memref<8x32xf32, #tpu.memory_space<vmem>>, vector<8x32xf32>
    tpu.vector_store %arg8[%c0_54, %c0_55], %106 {strides = array<i32>} : memref<8x32xf32, #tpu.memory_space<vmem>>, vector<8x32xf32>,
    %c4 = arith.constant 4 : index
    %c0_56 = arith.constant 0 : index
    %c0_57 = arith.constant 0 : index
    %111 = vector.load %arg2[%c4, %c0_56, %c0_57] : memref<8x8x128xbf16, #tpu.memory_space<vmem>>, vector<1x8x128xbf16>
    %112 = vector.shape_cast %111 : vector<1x8x128xbf16> to vector<8x128xbf16>
    %113 = arith.extf %112 : vector<8x128xbf16> to vector<8x128xf32>
    %c0_58 = arith.constant 0 : index
    %c0_59 = arith.constant 0 : index
    %114 = vector.load %arg7[%c0_58, %c0_59] : memref<8x32xf32, #tpu.memory_space<vmem>>, vector<8x32xf32>
    %115 = arith.truncf %114 : vector<8x32xf32> to vector<8x32xbf16>
    %c0_60 = arith.constant 0 : index
    %c0_61 = arith.constant 0 : index
    %116 = vector.load %arg3[%c0_60, %c0_61] : memref<32x128xbf16, #tpu.memory_space<vmem>>, vector<32x128xbf16>
    %cst_62 = arith.constant dense<0.000000e+00> : vector<8x128xf32>
    %117 = tpu.matmul %115, %116, %cst_62 {dimension_numbers = #tpu.dot_dimension_numbers<[1], [0], [0], [1], [0, 0, 1, 1], [], []>} : vector<8x32xbf16>, vector<32x128xbf16>, vector<8x128xf32> -> vector<8x128xf32>
    %118 = arith.addf %113, %117 : vector<8x128xf32>
    %119 = vector.extract_strided_slice %118 {offsets = [0, 0], sizes = [8, 96], strides = [1, 1]} : vector<8x128xf32> to vector<8x96xf32>
    %120 = arith.negf %119 : vector<8x96xf32>
    %121 = math.exp %120 : vector<8x96xf32>
    %cst_63 = arith.constant 1.000000e+00 : f32
    %122 = vector.broadcast %cst_63 : f32 to vector<8x96xf32>
    %123 = arith.addf %122, %121 : vector<8x96xf32>
    %124 = arith.divf %122, %123 : vector<8x96xf32>
    %125 = vector.extract_strided_slice %124 {offsets = [0, 0], sizes = [8, 32], strides = [1, 1]} : vector<8x96xf32> to vector<8x32xf32>
    %126 = vector.extract_strided_slice %124 {offsets = [0, 32], sizes = [8, 32], strides = [1, 1]} : vector<8x96xf32> to vector<8x32xf32>
    %127 = vector.extract_strided_slice %124 {offsets = [0, 64], sizes = [8, 32], strides = [1, 1]} : vector<8x96xf32> to vector<8x32xf32>
    %128 = vector.extract_strided_slice %118 {offsets = [0, 96], sizes = [8, 32], strides = [1, 1]} : vector<8x128xf32> to vector<8x32xf32>
    %129 = math.tanh %128 : vector<8x32xf32>
    %c0_64 = arith.constant 0 : index
    %c0_65 = arith.constant 0 : index
    %130 = vector.load %arg8[%c0_64, %c0_65] : memref<8x32xf32, #tpu.memory_space<vmem>>, vector<8x32xf32>
    %131 = arith.mulf %126, %130 : vector<8x32xf32>
    %132 = arith.mulf %125, %129 : vector<8x32xf32>
    %133 = arith.addf %131, %132 : vector<8x32xf32>
    %134 = math.tanh %133 : vector<8x32xf32>
    %135 = arith.mulf %127, %134 : vector<8x32xf32>
    %c0_66 = arith.constant 0 : index
    %c0_67 = arith.constant 0 : index
    %136 = vector.load %arg7[%c0_66, %c0_67] : memref<8x32xf32, #tpu.memory_space<vmem>>, vector<8x32xf32>
    tpu.vector_store %arg7[%c0_66, %c0_67], %135 {strides = array<i32>} : memref<8x32xf32, #tpu.memory_space<vmem>>, vector<8x32xf32>,
    %c0_68 = arith.constant 0 : index
    %c0_69 = arith.constant 0 : index
    %137 = vector.load %arg8[%c0_68, %c0_69] : memref<8x32xf32, #tpu.memory_space<vmem>>, vector<8x32xf32>
    tpu.vector_store %arg8[%c0_68, %c0_69], %133 {strides = array<i32>} : memref<8x32xf32, #tpu.memory_space<vmem>>, vector<8x32xf32>,
    %c5 = arith.constant 5 : index
    %c0_70 = arith.constant 0 : index
    %c0_71 = arith.constant 0 : index
    %138 = vector.load %arg2[%c5, %c0_70, %c0_71] : memref<8x8x128xbf16, #tpu.memory_space<vmem>>, vector<1x8x128xbf16>
    %139 = vector.shape_cast %138 : vector<1x8x128xbf16> to vector<8x128xbf16>
    %140 = arith.extf %139 : vector<8x128xbf16> to vector<8x128xf32>
    %c0_72 = arith.constant 0 : index
    %c0_73 = arith.constant 0 : index
    %141 = vector.load %arg7[%c0_72, %c0_73] : memref<8x32xf32, #tpu.memory_space<vmem>>, vector<8x32xf32>
    %142 = arith.truncf %141 : vector<8x32xf32> to vector<8x32xbf16>
    %c0_74 = arith.constant 0 : index
    %c0_75 = arith.constant 0 : index
    %143 = vector.load %arg3[%c0_74, %c0_75] : memref<32x128xbf16, #tpu.memory_space<vmem>>, vector<32x128xbf16>
    %cst_76 = arith.constant dense<0.000000e+00> : vector<8x128xf32>
    %144 = tpu.matmul %142, %143, %cst_76 {dimension_numbers = #tpu.dot_dimension_numbers<[1], [0], [0], [1], [0, 0, 1, 1], [], []>} : vector<8x32xbf16>, vector<32x128xbf16>, vector<8x128xf32> -> vector<8x128xf32>
    %145 = arith.addf %140, %144 : vector<8x128xf32>
    %146 = vector.extract_strided_slice %145 {offsets = [0, 0], sizes = [8, 96], strides = [1, 1]} : vector<8x128xf32> to vector<8x96xf32>
    %147 = arith.negf %146 : vector<8x96xf32>
    %148 = math.exp %147 : vector<8x96xf32>
    %cst_77 = arith.constant 1.000000e+00 : f32
    %149 = vector.broadcast %cst_77 : f32 to vector<8x96xf32>
    %150 = arith.addf %149, %148 : vector<8x96xf32>
    %151 = arith.divf %149, %150 : vector<8x96xf32>
    %152 = vector.extract_strided_slice %151 {offsets = [0, 0], sizes = [8, 32], strides = [1, 1]} : vector<8x96xf32> to vector<8x32xf32>
    %153 = vector.extract_strided_slice %151 {offsets = [0, 32], sizes = [8, 32], strides = [1, 1]} : vector<8x96xf32> to vector<8x32xf32>
    %154 = vector.extract_strided_slice %151 {offsets = [0, 64], sizes = [8, 32], strides = [1, 1]} : vector<8x96xf32> to vector<8x32xf32>
    %155 = vector.extract_strided_slice %145 {offsets = [0, 96], sizes = [8, 32], strides = [1, 1]} : vector<8x128xf32> to vector<8x32xf32>
    %156 = math.tanh %155 : vector<8x32xf32>
    %c0_78 = arith.constant 0 : index
    %c0_79 = arith.constant 0 : index
    %157 = vector.load %arg8[%c0_78, %c0_79] : memref<8x32xf32, #tpu.memory_space<vmem>>, vector<8x32xf32>
    %158 = arith.mulf %153, %157 : vector<8x32xf32>
    %159 = arith.mulf %152, %156 : vector<8x32xf32>
    %160 = arith.addf %158, %159 : vector<8x32xf32>
    %161 = math.tanh %160 : vector<8x32xf32>
    %162 = arith.mulf %154, %161 : vector<8x32xf32>
    %c0_80 = arith.constant 0 : index
    %c0_81 = arith.constant 0 : index
    %163 = vector.load %arg7[%c0_80, %c0_81] : memref<8x32xf32, #tpu.memory_space<vmem>>, vector<8x32xf32>
    tpu.vector_store %arg7[%c0_80, %c0_81], %162 {strides = array<i32>} : memref<8x32xf32, #tpu.memory_space<vmem>>, vector<8x32xf32>,
    %c0_82 = arith.constant 0 : index
    %c0_83 = arith.constant 0 : index
    %164 = vector.load %arg8[%c0_82, %c0_83] : memref<8x32xf32, #tpu.memory_space<vmem>>, vector<8x32xf32>
    tpu.vector_store %arg8[%c0_82, %c0_83], %160 {strides = array<i32>} : memref<8x32xf32, #tpu.memory_space<vmem>>, vector<8x32xf32>,
    %c6 = arith.constant 6 : index
    %c0_84 = arith.constant 0 : index
    %c0_85 = arith.constant 0 : index
    %165 = vector.load %arg2[%c6, %c0_84, %c0_85] : memref<8x8x128xbf16, #tpu.memory_space<vmem>>, vector<1x8x128xbf16>
    %166 = vector.shape_cast %165 : vector<1x8x128xbf16> to vector<8x128xbf16>
    %167 = arith.extf %166 : vector<8x128xbf16> to vector<8x128xf32>
    %c0_86 = arith.constant 0 : index
    %c0_87 = arith.constant 0 : index
    %168 = vector.load %arg7[%c0_86, %c0_87] : memref<8x32xf32, #tpu.memory_space<vmem>>, vector<8x32xf32>
    %169 = arith.truncf %168 : vector<8x32xf32> to vector<8x32xbf16>
    %c0_88 = arith.constant 0 : index
    %c0_89 = arith.constant 0 : index
    %170 = vector.load %arg3[%c0_88, %c0_89] : memref<32x128xbf16, #tpu.memory_space<vmem>>, vector<32x128xbf16>
    %cst_90 = arith.constant dense<0.000000e+00> : vector<8x128xf32>
    %171 = tpu.matmul %169, %170, %cst_90 {dimension_numbers = #tpu.dot_dimension_numbers<[1], [0], [0], [1], [0, 0, 1, 1], [], []>} : vector<8x32xbf16>, vector<32x128xbf16>, vector<8x128xf32> -> vector<8x128xf32>
    %172 = arith.addf %167, %171 : vector<8x128xf32>
    %173 = vector.extract_strided_slice %172 {offsets = [0, 0], sizes = [8, 96], strides = [1, 1]} : vector<8x128xf32> to vector<8x96xf32>
    %174 = arith.negf %173 : vector<8x96xf32>
    %175 = math.exp %174 : vector<8x96xf32>
    %cst_91 = arith.constant 1.000000e+00 : f32
    %176 = vector.broadcast %cst_91 : f32 to vector<8x96xf32>
    %177 = arith.addf %176, %175 : vector<8x96xf32>
    %178 = arith.divf %176, %177 : vector<8x96xf32>
    %179 = vector.extract_strided_slice %178 {offsets = [0, 0], sizes = [8, 32], strides = [1, 1]} : vector<8x96xf32> to vector<8x32xf32>
    %180 = vector.extract_strided_slice %178 {offsets = [0, 32], sizes = [8, 32], strides = [1, 1]} : vector<8x96xf32> to vector<8x32xf32>
    %181 = vector.extract_strided_slice %178 {offsets = [0, 64], sizes = [8, 32], strides = [1, 1]} : vector<8x96xf32> to vector<8x32xf32>
    %182 = vector.extract_strided_slice %172 {offsets = [0, 96], sizes = [8, 32], strides = [1, 1]} : vector<8x128xf32> to vector<8x32xf32>
    %183 = math.tanh %182 : vector<8x32xf32>
    %c0_92 = arith.constant 0 : index
    %c0_93 = arith.constant 0 : index
    %184 = vector.load %arg8[%c0_92, %c0_93] : memref<8x32xf32, #tpu.memory_space<vmem>>, vector<8x32xf32>
    %185 = arith.mulf %180, %184 : vector<8x32xf32>
    %186 = arith.mulf %179, %183 : vector<8x32xf32>
    %187 = arith.addf %185, %186 : vector<8x32xf32>
    %188 = math.tanh %187 : vector<8x32xf32>
    %189 = arith.mulf %181, %188 : vector<8x32xf32>
    %c0_94 = arith.constant 0 : index
    %c0_95 = arith.constant 0 : index
    %190 = vector.load %arg7[%c0_94, %c0_95] : memref<8x32xf32, #tpu.memory_space<vmem>>, vector<8x32xf32>
    tpu.vector_store %arg7[%c0_94, %c0_95], %189 {strides = array<i32>} : memref<8x32xf32, #tpu.memory_space<vmem>>, vector<8x32xf32>,
    %c0_96 = arith.constant 0 : index
    %c0_97 = arith.constant 0 : index
    %191 = vector.load %arg8[%c0_96, %c0_97] : memref<8x32xf32, #tpu.memory_space<vmem>>, vector<8x32xf32>
    tpu.vector_store %arg8[%c0_96, %c0_97], %187 {strides = array<i32>} : memref<8x32xf32, #tpu.memory_space<vmem>>, vector<8x32xf32>,
    %c7 = arith.constant 7 : index
    %c0_98 = arith.constant 0 : index
    %c0_99 = arith.constant 0 : index
    %192 = vector.load %arg2[%c7, %c0_98, %c0_99] : memref<8x8x128xbf16, #tpu.memory_space<vmem>>, vector<1x8x128xbf16>
    %193 = vector.shape_cast %192 : vector<1x8x128xbf16> to vector<8x128xbf16>
    %194 = arith.extf %193 : vector<8x128xbf16> to vector<8x128xf32>
    %c0_100 = arith.constant 0 : index
    %c0_101 = arith.constant 0 : index
    %195 = vector.load %arg7[%c0_100, %c0_101] : memref<8x32xf32, #tpu.memory_space<vmem>>, vector<8x32xf32>
    %196 = arith.truncf %195 : vector<8x32xf32> to vector<8x32xbf16>
    %c0_102 = arith.constant 0 : index
    %c0_103 = arith.constant 0 : index
    %197 = vector.load %arg3[%c0_102, %c0_103] : memref<32x128xbf16, #tpu.memory_space<vmem>>, vector<32x128xbf16>
    %cst_104 = arith.constant dense<0.000000e+00> : vector<8x128xf32>
    %198 = tpu.matmul %196, %197, %cst_104 {dimension_numbers = #tpu.dot_dimension_numbers<[1], [0], [0], [1], [0, 0, 1, 1], [], []>} : vector<8x32xbf16>, vector<32x128xbf16>, vector<8x128xf32> -> vector<8x128xf32>
    %199 = arith.addf %194, %198 : vector<8x128xf32>
    %200 = vector.extract_strided_slice %199 {offsets = [0, 0], sizes = [8, 96], strides = [1, 1]} : vector<8x128xf32> to vector<8x96xf32>
    %201 = arith.negf %200 : vector<8x96xf32>
    %202 = math.exp %201 : vector<8x96xf32>
    %cst_105 = arith.constant 1.000000e+00 : f32
    %203 = vector.broadcast %cst_105 : f32 to vector<8x96xf32>
    %204 = arith.addf %203, %202 : vector<8x96xf32>
    %205 = arith.divf %203, %204 : vector<8x96xf32>
    %206 = vector.extract_strided_slice %205 {offsets = [0, 0], sizes = [8, 32], strides = [1, 1]} : vector<8x96xf32> to vector<8x32xf32>
    %207 = vector.extract_strided_slice %205 {offsets = [0, 32], sizes = [8, 32], strides = [1, 1]} : vector<8x96xf32> to vector<8x32xf32>
    %208 = vector.extract_strided_slice %205 {offsets = [0, 64], sizes = [8, 32], strides = [1, 1]} : vector<8x96xf32> to vector<8x32xf32>
    %209 = vector.extract_strided_slice %199 {offsets = [0, 96], sizes = [8, 32], strides = [1, 1]} : vector<8x128xf32> to vector<8x32xf32>
    %210 = math.tanh %209 : vector<8x32xf32>
    %c0_106 = arith.constant 0 : index
    %c0_107 = arith.constant 0 : index
    %211 = vector.load %arg8[%c0_106, %c0_107] : memref<8x32xf32, #tpu.memory_space<vmem>>, vector<8x32xf32>
    %212 = arith.mulf %207, %211 : vector<8x32xf32>
    %213 = arith.mulf %206, %210 : vector<8x32xf32>
    %214 = arith.addf %212, %213 : vector<8x32xf32>
    %215 = math.tanh %214 : vector<8x32xf32>
    %216 = arith.mulf %208, %215 : vector<8x32xf32>
    %c0_108 = arith.constant 0 : index
    %c0_109 = arith.constant 0 : index
    %217 = vector.load %arg7[%c0_108, %c0_109] : memref<8x32xf32, #tpu.memory_space<vmem>>, vector<8x32xf32>
    tpu.vector_store %arg7[%c0_108, %c0_109], %216 {strides = array<i32>} : memref<8x32xf32, #tpu.memory_space<vmem>>, vector<8x32xf32>,
    %c0_110 = arith.constant 0 : index
    %c0_111 = arith.constant 0 : index
    %218 = vector.load %arg8[%c0_110, %c0_111] : memref<8x32xf32, #tpu.memory_space<vmem>>, vector<8x32xf32>
    tpu.vector_store %arg8[%c0_110, %c0_111], %214 {strides = array<i32>} : memref<8x32xf32, #tpu.memory_space<vmem>>, vector<8x32xf32>,
    %c0_i32_112 = arith.constant 0 : i32
    %219 = arith.cmpi eq, %arg1, %c0_i32_112 : i32
    %220 = arith.extui %219 : i1 to i32
    %c0_i32_113 = arith.constant 0 : i32
    %221 = arith.cmpi ne, %220, %c0_i32_113 : i32
    scf.if %221 {
      %c0_114 = arith.constant 0 : index
      %c0_115 = arith.constant 0 : index
      %222 = vector.load %arg7[%c0_114, %c0_115] : memref<8x32xf32, #tpu.memory_space<vmem>>, vector<8x32xf32>
      %223 = arith.truncf %222 : vector<8x32xf32> to vector<8x32xbf16>
      %c0_116 = arith.constant 0 : index
      %c0_117 = arith.constant 0 : index
      %224 = vector.load %arg4[%c0_116, %c0_117] : memref<32x2xbf16, #tpu.memory_space<vmem>>, vector<32x2xbf16>
      %cst_118 = arith.constant dense<0.000000e+00> : vector<8x2xf32>
      %225 = tpu.matmul %223, %224, %cst_118 {dimension_numbers = #tpu.dot_dimension_numbers<[1], [0], [0], [1], [0, 0, 1, 1], [], []>} : vector<8x32xbf16>, vector<32x2xbf16>, vector<8x2xf32> -> vector<8x2xf32>
      %c0_119 = arith.constant 0 : index
      %c0_120 = arith.constant 0 : index
      %226 = vector.load %arg5[%c0_119, %c0_120] : memref<1x2xf32, #tpu.memory_space<vmem>>, vector<1x2xf32>
      %227 = vector.broadcast %226 : vector<1x2xf32> to vector<8x2xf32>
      %228 = arith.addf %225, %227 : vector<8x2xf32>
      %c0_121 = arith.constant 0 : index
      %c0_122 = arith.constant 0 : index
      %229 = vector.load %arg6[%c0_121, %c0_122] : memref<8x2xf32, #tpu.memory_space<vmem>>, vector<8x2xf32>
      tpu.vector_store %arg6[%c0_121, %c0_122], %228 {strides = array<i32>} : memref<8x2xf32, #tpu.memory_space<vmem>>, vector<8x2xf32>,
    } else {
    }
    return
  }
  func.func @transform_0(%arg0: i32, %arg1: i32) -> (i32, i32, i32) {
    %c0_i32 = arith.constant 0 : i32
    %c0_i32_0 = arith.constant 0 : i32
    return %arg1, %arg0, %c0_i32 : i32, i32, i32
  }
  func.func @transform_1(%arg0: i32, %arg1: i32) -> (i32, i32) {
    %c0_i32 = arith.constant 0 : i32
    %c0_i32_0 = arith.constant 0 : i32
    %c0_i32_1 = arith.constant 0 : i32
    return %c0_i32, %c0_i32_0 : i32, i32
  }
  func.func @transform_2(%arg0: i32, %arg1: i32) -> (i32, i32) {
    %c0_i32 = arith.constant 0 : i32
    %c0_i32_0 = arith.constant 0 : i32
    %c0_i32_1 = arith.constant 0 : i32
    return %c0_i32, %c0_i32_0 : i32, i32
  }
  func.func @transform_3(%arg0: i32, %arg1: i32) -> (i32, i32) {
    %c0_i32 = arith.constant 0 : i32
    %c0_i32_0 = arith.constant 0 : i32
    %c0_i32_1 = arith.constant 0 : i32
    return %c0_i32, %c0_i32_0 : i32, i32
  }
  func.func @transform_4(%arg0: i32, %arg1: i32) -> (i32, i32) {
    %c0_i32 = arith.constant 0 : i32
    %c0_i32_0 = arith.constant 0 : i32
    return %arg0, %c0_i32 : i32, i32
  }
}

</mosaic_0001>

<bundles_post_ra>
// kernel: tpu_custom_call.1
= control target key start
LH: loop header
LB: loop body
LE: loop exit
PB: predicated region body
PF: predicated region fallthrough
CT: control target
= control target key end

     0   :  { %9 = vsyncpa [#allocation5], 0  ;;  %s1195_s15 = smov [#allocation4]   ;;  %s1405_s0 = inlined_call_operand.hbm [shape: bf16[8,8,128], index: 0, kind: input, shape index: {}]   ;;  %s1406_s1 = inlined_call_operand.vmem [shape: bf16[32,128], index: 1, kind: input, shape index: {}]   ;;  %s1407_s2 = inlined_call_operand.vmem [shape: bf16[32,2], index: 2, kind: input, shape index: {}]   ;;  %s1408_s3 = inlined_call_operand.vmem [shape: f32[1,2], index: 3, kind: input, shape index: {}]   ;;  %s1409_s4 = inlined_call_operand.vmem [shape: f32[8,2], index: 4, kind: output, shape index: {}]  }
   0x1   :  { %s15_s16 = sshll.u32 %s1195_s15, 4  ;;  %s16_s16 = int_to_ptr.vmem [resolvable:$true] %s15_s16 }
   0x2   :  { %s1181_s17 = scalar_lea.vmem %s16_s16, 512  ;;  %p1186_p1 = scmp.lt.s32.totalorder %s16_s16, %s16_s16 }
   0x3   :  { %p1182_p0 = scmp.ne.s32.totalorder %s16_s16, %s1181_s17  ;;  %p1187_p2 = scmp.lt.s32.totalorder %s1181_s17, %s1181_s17 }
   0x5   :  { %p1188_p3 = por %p1187_p2, %p1186_p1 }
   0x7   :  { %p1189_p4 = pnand %p1188_p3, %p1182_p0 }
   0x9   :  { %1192 = shalt.err (!%p1189_p4)
}
   0xa   :  { %s1196_s18 = smov 64   ;;  %s1197_s19 = smov 4  }
   0xb   :  { %21 = dma.hbm_to_vmem [thread:$0]  %s1405_s0, 512, %s16_s16, [#allocation5], %s1196_s18, %s1196_s18, %s1197_s19  }
   0xc   :  { %1193 = dma.done.wait [#allocation5], 512  }
   0xd   :  { %1194 = vsyncadd [#allocation5], 4294966784  ;;  %vm36_vm0 = vcmask 261120   ;;  %v1198_v0 = vmov 0.0   ;;  %vm1199_vm1 = vmmov 0   ;;  %v1091_v1 = vld [vmem:[%s1406_s1 + $0x8] sm:$0xff]  }
   0xe   :  { %1012 = vmatprep.subr.bf16.mxu0 %v1198_v0  ;;  %1016 = vmatprep.mubr.msk.bf16.mxu0 %vm1199_vm1, %v1198_v0  ;;  %37 = vst.msk [vmem:[#allocation2] sm:$0xff] %vm36_vm0, %v1198_v0  ;;  %38 = vst.msk [vmem:[#allocation3] sm:$0xff] %vm36_vm0, %v1198_v0  ;;  %v1092_v2 = vld [vmem:[%s1406_s1] sm:$0xff]   ;;  %v39_v5 = vld [vmem:[#allocation4] sm:$0xff]   ;;  %s1200_s25 = smov 32   ;;  %s1201_s26 = smov 96  }
   0xf   :  { %1020 = vmatprep.subr.bf16.mxu1 %v1198_v0  ;;  %1024 = vmatprep.mubr.msk.bf16.mxu1 %vm1199_vm1, %v1198_v0  ;;  %v40_v6 = vunpack.c.l.bf16 %v39_v5  ;;  %v1093_v25 = vld [vmem:[%s1406_s1 + $0x8] sm:$0xff]   ;;  %v1094_v26 = vld [vmem:[%s1406_s1] sm:$0xff]   ;;  %v145_v34 = vunpack.c.h.bf16 %v39_v5  ;;  %v248_v61 = vld [vmem:[#allocation4 + $0x8] sm:$0xff]   ;;  %vm942_vm2 = vcmask 15360  }
  0x10   :  { %1013 = vmatpush3.bf16.msra.mxu0 %v1091_v1  ;;  %1021 = vmatpush3.bf16.msra.mxu1 %v1093_v25  ;;  %v1095_v52 = vld [vmem:[%s1406_s1 + $0x8] sm:$0xff]   ;;  %v1096_v53 = vld [vmem:[%s1406_s1] sm:$0xff]   ;;  %v249_v62 = vunpack.c.l.bf16 %v248_v61 }
  0x11   :  { %1014 = vmatprep.subr.bf16.mxu0 %v1198_v0  ;;  %1022 = vmatprep.subr.bf16.mxu1 %v1198_v0 }
  0x14   :  { %1015 = vmatpush3.bf16.msra.mxu0 %v1092_v2  ;;  %1023 = vmatpush3.bf16.msra.mxu1 %v1094_v26  ;;  %v353_v26 = vunpack.c.h.bf16 %v248_v61 }
  0x15   :  { %v41_v3 = vld [vmem:[#allocation2] sm:$0xff]  ;;  %1028 = vmatprep.subr.bf16.mxu0 %v1198_v0  ;;  %v111_v13 = vld [vmem:[#allocation3] sm:$0xff]  ;;  %1036 = vmatprep.subr.bf16.mxu1 %v1198_v0 }
  0x16   :  { %v42_v4 = vpack.c.bf16 %v41_v3, %v41_v3 }
  0x18   :  { %1017 = vmatmul.mubr.msk.bf16.vlgmr.msra.gmra.mxu0 %vm36_vm0, %v42_v4 }
  0x19   :  { %1032 = vmatprep.mubr.msk.bf16.mxu0 %vm1199_vm1, %v1198_v0  ;;  %1029 = vmatpush3.bf16.msra.mxu0 %v1095_v52 }
  0x1a   :  { %1030 = vmatprep.subr.bf16.mxu0 %v1198_v0 }
  0x1d   :  { %1031 = vmatpush3.bf16.msra.mxu0 %v1096_v53  ;;  %v456_v53 = vld [vmem:[#allocation4 + $0x10] sm:$0xff]  }
  0x1e   :  { %1044 = vmatprep.subr.bf16.mxu0 %v1198_v0 }
  0xd8   :  { %v97_v7 = vpop.f32.mrf.mxu0 }
  0xd9   :  { %v103_v8 = vadd.f32 %v97_v7, %v40_v6 }
  0xda   :  { %v1018_v9 = vpop.f32.mrf.mxu0 }
  0xdb   :  { %1109 = vtanh.f32 %v103_v8  ;;  %v952_v14 = vmul.f32 -1.442695, %v103_v8 }
  0xdc   :  { %v100_v10 = vpop.f32.mrf.mxu0 }
  0xdd   :  { %1111 = vpow2.f32 %v952_v14 }
  0xde   :  { %v1019_v11 = vpop.f32.mrf.mxu0 }
  0xe8   :  { %v1110_v12 = vpop.eup %1109 }
  0xe9   :  { %118 = vrot.lane.b32.xlu0 %v1110_v12, %s1200_s25 }
  0xea   :  { %v1112_v15 = vpop.eup %1111 }
  0xeb   :  { %v107_v16 = vadd.f32 1.0, %v1112_v15 }
  0xed   :  { %113 = vrot.lane.b32.xlu0 %v111_v13, %s1200_s25  ;;  %1113 = vrcp.f32 %v107_v16 }
  0xfa   :  { %v1114_v17 = vpop.eup %1113 }
 0x15b   :  { %v119_v18 = vpop.permute.xlu0 %118 }
 0x15c   :  { %v121_v19 = vmul.f32 %v1114_v17, %v119_v18  ;;  %v1098_v18 = vld [vmem:[%s1406_s1] sm:$0xff]  }
 0x15e   :  { %123 = vrot.lane.b32.xlu1 %v121_v19, %s1200_s25 }
 0x15f   :  { %v114_v20 = vpop.permute.xlu0 %113 }
 0x160   :  { %v116_v21 = vmul.f32 %v1114_v17, %v114_v20 }
 0x1d0   :  { %v124_v22 = vpop.permute.xlu1 %123 }
 0x1d1   :  { %v126_v23 = vadd.f32 %v124_v22, %v116_v21 }
 0x1d3   :  { %1115 = vtanh.f32 %v126_v23 }
 0x1e0   :  { %v1116_v24 = vpop.eup %1115 }
 0x1e1   :  { %129 = vrot.lane.b32.xlu1 %v1116_v24, %s1200_s25 }
 0x1e5   :  { %139 = vrot.lane.b32.xlu1 %v126_v23, %s1201_s26 }
 0x253   :  { %v130_v27 = vpop.permute.xlu1 %129 }
 0x254   :  { %v132_v28 = vmul.f32 %v1114_v17, %v130_v27  ;;  %v1097_v17 = vld [vmem:[%s1406_s1 + $0x8] sm:$0xff]  }
 0x256   :  { %134 = vrot.lane.b32.xlu0 %v132_v28, %s1196_s18 }
 0x257   :  { %v140_v29 = vpop.permute.xlu1 %139 }
 0x258   :  { %142 = vst.msk [vmem:[#allocation3] sm:$0xff] %vm36_vm0, %v140_v29 }
 0x25f   :  { %v215_v30 = vld [vmem:[#allocation3] sm:$0xff] }
 0x260   :  { %217 = vrot.lane.b32.xlu1 %v215_v30, %s1200_s25 }
 0x2c8   :  { %v135_v31 = vpop.permute.xlu0 %134 }
 0x2c9   :  { %137 = vst.msk [vmem:[#allocation2] sm:$0xff] %vm36_vm0, %v135_v31 }
 0x2d0   :  { %v146_v32 = vld [vmem:[#allocation2] sm:$0xff] }
 0x2d1   :  { %v147_v33 = vpack.c.bf16 %v146_v32, %v146_v32 }
 0x2d2   :  { %v218_v47 = vpop.permute.xlu1 %217 }
 0x2d3   :  { %1025 = vmatmul.mubr.msk.bf16.vlgmr.msra.gmra.mxu1 %vm36_vm0, %v147_v33 }
 0x2d4   :  { %1040 = vmatprep.mubr.msk.bf16.mxu1 %vm1199_vm1, %v1198_v0  ;;  %1037 = vmatpush3.bf16.msra.mxu1 %v1097_v17 }
 0x2d5   :  { %1038 = vmatprep.subr.bf16.mxu1 %v1198_v0 }
 0x2d8   :  { %1039 = vmatpush3.bf16.msra.mxu1 %v1098_v18  ;;  %v561_v18 = vunpack.c.h.bf16 %v456_v53 }
 0x2d9   :  { %1052 = vmatprep.subr.bf16.mxu1 %v1198_v0 }
 0x393   :  { %v201_v35 = vpop.f32.mrf.mxu1 }
 0x394   :  { %v207_v36 = vadd.f32 %v201_v35, %v145_v34 }
 0x395   :  { %v1026_v37 = vpop.f32.mrf.mxu1 }
 0x396   :  { %1117 = vtanh.f32 %v207_v36  ;;  %v956_v41 = vmul.f32 -1.442695, %v207_v36 }
 0x397   :  { %v204_v38 = vpop.f32.mrf.mxu1 }
 0x398   :  { %1119 = vpow2.f32 %v956_v41 }
 0x399   :  { %v1027_v39 = vpop.f32.mrf.mxu1 }
 0x3a3   :  { %v1118_v40 = vpop.eup %1117 }
 0x3a4   :  { %222 = vrot.lane.b32.xlu0 %v1118_v40, %s1200_s25 }
 0x3a5   :  { %v1120_v42 = vpop.eup %1119 }
 0x3a6   :  { %v211_v43 = vadd.f32 1.0, %v1120_v42 }
 0x3a8   :  { %1121 = vrcp.f32 %v211_v43 }
 0x3b5   :  { %v1122_v44 = vpop.eup %1121 }
 0x3b6   :  { %v220_v48 = vmul.f32 %v1122_v44, %v218_v47 }
 0x416   :  { %v223_v45 = vpop.permute.xlu0 %222 }
 0x417   :  { %v225_v46 = vmul.f32 %v1122_v44, %v223_v45  ;;  %v1100_v45 = vld [vmem:[%s1406_s1] sm:$0xff]  }
 0x419   :  { %227 = vrot.lane.b32.xlu0 %v225_v46, %s1200_s25 }
 0x48b   :  { %v228_v49 = vpop.permute.xlu0 %227 }
 0x48c   :  { %v230_v50 = vadd.f32 %v228_v49, %v220_v48 }
 0x48e   :  { %1123 = vtanh.f32 %v230_v50 }
 0x49b   :  { %v1124_v51 = vpop.eup %1123 }
 0x49c   :  { %233 = vrot.lane.b32.xlu1 %v1124_v51, %s1200_s25 }
 0x4a0   :  { %243 = vrot.lane.b32.xlu1 %v230_v50, %s1201_s26 }
 0x50e   :  { %v234_v54 = vpop.permute.xlu1 %233 }
 0x50f   :  { %v236_v55 = vmul.f32 %v1122_v44, %v234_v54  ;;  %v1099_v44 = vld [vmem:[%s1406_s1 + $0x8] sm:$0xff]   ;;  %v457_v54 = vunpack.c.l.bf16 %v456_v53 }
 0x511   :  { %238 = vrot.lane.b32.xlu0 %v236_v55, %s1196_s18 }
 0x512   :  { %v244_v56 = vpop.permute.xlu1 %243 }
 0x513   :  { %246 = vst.msk [vmem:[#allocation3] sm:$0xff] %vm36_vm0, %v244_v56 }
 0x51a   :  { %v319_v57 = vld [vmem:[#allocation3] sm:$0xff] }
 0x51b   :  { %321 = vrot.lane.b32.xlu1 %v319_v57, %s1200_s25 }
 0x583   :  { %v239_v58 = vpop.permute.xlu0 %238 }
 0x584   :  { %241 = vst.msk [vmem:[#allocation2] sm:$0xff] %vm36_vm0, %v239_v58 }
 0x58b   :  { %v250_v59 = vld [vmem:[#allocation2] sm:$0xff] }
 0x58c   :  { %v251_v60 = vpack.c.bf16 %v250_v59, %v250_v59 }
 0x58d   :  { %v322_v12 = vpop.permute.xlu1 %321 }
 0x58e   :  { %1033 = vmatmul.mubr.msk.bf16.vlgmr.msra.gmra.mxu0 %vm36_vm0, %v251_v60 }
 0x58f   :  { %1048 = vmatprep.mubr.msk.bf16.mxu0 %vm1199_vm1, %v1198_v0  ;;  %1045 = vmatpush3.bf16.msra.mxu0 %v1099_v44 }
 0x590   :  { %1046 = vmatprep.subr.bf16.mxu0 %v1198_v0 }
 0x593   :  { %1047 = vmatpush3.bf16.msra.mxu0 %v1100_v45  ;;  %v664_v45 = vld [vmem:[#allocation4 + $0x18] sm:$0xff]  }
 0x594   :  { %1060 = vmatprep.subr.bf16.mxu0 %v1198_v0 }
 0x64e   :  { %v305_v63 = vpop.f32.mrf.mxu0 }
 0x64f   :  { %v311_v1 = vadd.f32 %v305_v63, %v249_v62 }
 0x650   :  { %v1034_v2 = vpop.f32.mrf.mxu0 }
 0x651   :  { %1125 = vtanh.f32 %v311_v1  ;;  %v960_v6 = vmul.f32 -1.442695, %v311_v1 }
 0x652   :  { %v308_v3 = vpop.f32.mrf.mxu0 }
 0x653   :  { %1127 = vpow2.f32 %v960_v6 }
 0x654   :  { %v1035_v4 = vpop.f32.mrf.mxu0 }
 0x65e   :  { %v1126_v5 = vpop.eup %1125 }
 0x65f   :  { %326 = vrot.lane.b32.xlu0 %v1126_v5, %s1200_s25 }
 0x660   :  { %v1128_v7 = vpop.eup %1127 }
 0x661   :  { %v315_v8 = vadd.f32 1.0, %v1128_v7 }
 0x663   :  { %1129 = vrcp.f32 %v315_v8 }
 0x670   :  { %v1130_v9 = vpop.eup %1129 }
 0x671   :  { %v324_v13 = vmul.f32 %v1130_v9, %v322_v12 }
 0x6d1   :  { %v327_v10 = vpop.permute.xlu0 %326 }
 0x6d2   :  { %v329_v11 = vmul.f32 %v1130_v9, %v327_v10  ;;  %v1102_v10 = vld [vmem:[%s1406_s1] sm:$0xff]  }
 0x6d4   :  { %331 = vrot.lane.b32.xlu0 %v329_v11, %s1200_s25 }
 0x746   :  { %v332_v14 = vpop.permute.xlu0 %331 }
 0x747   :  { %v334_v15 = vadd.f32 %v332_v14, %v324_v13 }
 0x749   :  { %1131 = vtanh.f32 %v334_v15 }
 0x756   :  { %v1132_v16 = vpop.eup %1131 }
 0x757   :  { %337 = vrot.lane.b32.xlu1 %v1132_v16, %s1200_s25 }
 0x75b   :  { %347 = vrot.lane.b32.xlu1 %v334_v15, %s1201_s26 }
 0x7c9   :  { %v338_v19 = vpop.permute.xlu1 %337 }
 0x7ca   :  { %v340_v20 = vmul.f32 %v1130_v9, %v338_v19  ;;  %v1101_v9 = vld [vmem:[%s1406_s1 + $0x8] sm:$0xff]  }
 0x7cc   :  { %342 = vrot.lane.b32.xlu0 %v340_v20, %s1196_s18 }
 0x7cd   :  { %v348_v21 = vpop.permute.xlu1 %347 }
 0x7ce   :  { %350 = vst.msk [vmem:[#allocation3] sm:$0xff] %vm36_vm0, %v348_v21 }
 0x7d5   :  { %v423_v22 = vld [vmem:[#allocation3] sm:$0xff] }
 0x7d6   :  { %425 = vrot.lane.b32.xlu1 %v423_v22, %s1200_s25 }
 0x83e   :  { %v343_v23 = vpop.permute.xlu0 %342 }
 0x83f   :  { %345 = vst.msk [vmem:[#allocation2] sm:$0xff] %vm36_vm0, %v343_v23 }
 0x846   :  { %v354_v24 = vld [vmem:[#allocation2] sm:$0xff] }
 0x847   :  { %v355_v25 = vpack.c.bf16 %v354_v24, %v354_v24 }
 0x848   :  { %v426_v39 = vpop.permute.xlu1 %425 }
 0x849   :  { %1041 = vmatmul.mubr.msk.bf16.vlgmr.msra.gmra.mxu1 %vm36_vm0, %v355_v25 }
 0x84a   :  { %1056 = vmatprep.mubr.msk.bf16.mxu1 %vm1199_vm1, %v1198_v0  ;;  %1053 = vmatpush3.bf16.msra.mxu1 %v1101_v9 }
 0x84b   :  { %1054 = vmatprep.subr.bf16.mxu1 %v1198_v0 }
 0x84e   :  { %1055 = vmatpush3.bf16.msra.mxu1 %v1102_v10  ;;  %v769_v10 = vunpack.c.h.bf16 %v664_v45 }
 0x84f   :  { %1068 = vmatprep.subr.bf16.mxu1 %v1198_v0 }
 0x909   :  { %v409_v27 = vpop.f32.mrf.mxu1 }
 0x90a   :  { %v415_v28 = vadd.f32 %v409_v27, %v353_v26 }
 0x90b   :  { %v1042_v29 = vpop.f32.mrf.mxu1 }
 0x90c   :  { %1133 = vtanh.f32 %v415_v28  ;;  %v964_v33 = vmul.f32 -1.442695, %v415_v28 }
 0x90d   :  { %v412_v30 = vpop.f32.mrf.mxu1 }
 0x90e   :  { %1135 = vpow2.f32 %v964_v33 }
 0x90f   :  { %v1043_v31 = vpop.f32.mrf.mxu1 }
 0x919   :  { %v1134_v32 = vpop.eup %1133 }
 0x91a   :  { %430 = vrot.lane.b32.xlu0 %v1134_v32, %s1200_s25 }
 0x91b   :  { %v1136_v34 = vpop.eup %1135 }
 0x91c   :  { %v419_v35 = vadd.f32 1.0, %v1136_v34 }
 0x91e   :  { %1137 = vrcp.f32 %v419_v35 }
 0x92b   :  { %v1138_v36 = vpop.eup %1137 }
 0x92c   :  { %v428_v40 = vmul.f32 %v1138_v36, %v426_v39 }
 0x98c   :  { %v431_v37 = vpop.permute.xlu0 %430 }
 0x98d   :  { %v433_v38 = vmul.f32 %v1138_v36, %v431_v37  ;;  %v1104_v37 = vld [vmem:[%s1406_s1] sm:$0xff]  }
 0x98f   :  { %435 = vrot.lane.b32.xlu0 %v433_v38, %s1200_s25 }
 0xa01   :  { %v436_v41 = vpop.permute.xlu0 %435 }
 0xa02   :  { %v438_v42 = vadd.f32 %v436_v41, %v428_v40 }
 0xa04   :  { %1139 = vtanh.f32 %v438_v42 }
 0xa11   :  { %v1140_v43 = vpop.eup %1139 }
 0xa12   :  { %441 = vrot.lane.b32.xlu1 %v1140_v43, %s1200_s25 }
 0xa16   :  { %451 = vrot.lane.b32.xlu1 %v438_v42, %s1201_s26 }
 0xa84   :  { %v442_v46 = vpop.permute.xlu1 %441 }
 0xa85   :  { %v444_v47 = vmul.f32 %v1138_v36, %v442_v46  ;;  %v1103_v36 = vld [vmem:[%s1406_s1 + $0x8] sm:$0xff]   ;;  %v665_v46 = vunpack.c.l.bf16 %v664_v45 }
 0xa87   :  { %446 = vrot.lane.b32.xlu0 %v444_v47, %s1196_s18 }
 0xa88   :  { %v452_v48 = vpop.permute.xlu1 %451 }
 0xa89   :  { %454 = vst.msk [vmem:[#allocation3] sm:$0xff] %vm36_vm0, %v452_v48 }
 0xa90   :  { %v527_v49 = vld [vmem:[#allocation3] sm:$0xff] }
 0xa91   :  { %529 = vrot.lane.b32.xlu1 %v527_v49, %s1200_s25 }
 0xaf9   :  { %v447_v50 = vpop.permute.xlu0 %446 }
 0xafa   :  { %449 = vst.msk [vmem:[#allocation2] sm:$0xff] %vm36_vm0, %v447_v50 }
 0xb01   :  { %v458_v51 = vld [vmem:[#allocation2] sm:$0xff] }
 0xb02   :  { %v459_v52 = vpack.c.bf16 %v458_v51, %v458_v51 }
 0xb03   :  { %v530_v4 = vpop.permute.xlu1 %529 }
 0xb04   :  { %1049 = vmatmul.mubr.msk.bf16.vlgmr.msra.gmra.mxu0 %vm36_vm0, %v459_v52 }
 0xb05   :  { %1064 = vmatprep.mubr.msk.bf16.mxu0 %vm1199_vm1, %v1198_v0  ;;  %1061 = vmatpush3.bf16.msra.mxu0 %v1103_v36  ;;  %v981_v36 = vld [vmem:[%s1408_s3] ss:$0 sm:$0xff] }
 0xb06   :  { %1062 = vmatprep.subr.bf16.mxu0 %v1198_v0 }
 0xb09   :  { %1063 = vmatpush3.bf16.msra.mxu0 %v1104_v37 }
 0xb0a   :  { %1076 = vmatprep.subr.bf16.mxu0 %v1198_v0 }
 0xbc4   :  { %v513_v55 = vpop.f32.mrf.mxu0 }
 0xbc5   :  { %v519_v56 = vadd.f32 %v513_v55, %v457_v54 }
 0xbc6   :  { %v1050_v57 = vpop.f32.mrf.mxu0 }
 0xbc7   :  { %1141 = vtanh.f32 %v519_v56  ;;  %v968_v61 = vmul.f32 -1.442695, %v519_v56 }
 0xbc8   :  { %v516_v58 = vpop.f32.mrf.mxu0 }
 0xbc9   :  { %1143 = vpow2.f32 %v968_v61 }
 0xbca   :  { %v1051_v59 = vpop.f32.mrf.mxu0 }
 0xbd4   :  { %v1142_v60 = vpop.eup %1141 }
 0xbd5   :  { %534 = vrot.lane.b32.xlu0 %v1142_v60, %s1200_s25 }
 0xbd6   :  { %v1144_v62 = vpop.eup %1143 }
 0xbd7   :  { %v523_v63 = vadd.f32 1.0, %v1144_v62 }
 0xbd9   :  { %1145 = vrcp.f32 %v523_v63 }
 0xbe6   :  { %v1146_v1 = vpop.eup %1145 }
 0xbe7   :  { %v532_v5 = vmul.f32 %v1146_v1, %v530_v4 }
 0xc47   :  { %v535_v2 = vpop.permute.xlu0 %534 }
 0xc48   :  { %v537_v3 = vmul.f32 %v1146_v1, %v535_v2  ;;  %v1106_v2 = vld [vmem:[%s1406_s1] sm:$0xff]  }
 0xc4a   :  { %539 = vrot.lane.b32.xlu0 %v537_v3, %s1200_s25 }
 0xcbc   :  { %v540_v6 = vpop.permute.xlu0 %539 }
 0xcbd   :  { %v542_v7 = vadd.f32 %v540_v6, %v532_v5 }
 0xcbf   :  { %1147 = vtanh.f32 %v542_v7 }
 0xccc   :  { %v1148_v8 = vpop.eup %1147 }
 0xccd   :  { %545 = vrot.lane.b32.xlu1 %v1148_v8, %s1200_s25 }
 0xcd1   :  { %555 = vrot.lane.b32.xlu1 %v542_v7, %s1201_s26 }
 0xd3f   :  { %v546_v11 = vpop.permute.xlu1 %545 }
 0xd40   :  { %v548_v12 = vmul.f32 %v1146_v1, %v546_v11  ;;  %v1105_v1 = vld [vmem:[%s1406_s1 + $0x8] sm:$0xff]  }
 0xd42   :  { %550 = vrot.lane.b32.xlu0 %v548_v12, %s1196_s18 }
 0xd43   :  { %v556_v13 = vpop.permute.xlu1 %555 }
 0xd44   :  { %558 = vst.msk [vmem:[#allocation3] sm:$0xff] %vm36_vm0, %v556_v13 }
 0xd4b   :  { %v631_v14 = vld [vmem:[#allocation3] sm:$0xff] }
 0xd4c   :  { %633 = vrot.lane.b32.xlu1 %v631_v14, %s1200_s25 }
 0xdb4   :  { %v551_v15 = vpop.permute.xlu0 %550 }
 0xdb5   :  { %553 = vst.msk [vmem:[#allocation2] sm:$0xff] %vm36_vm0, %v551_v15 }
 0xdbc   :  { %v562_v16 = vld [vmem:[#allocation2] sm:$0xff] }
 0xdbd   :  { %v563_v17 = vpack.c.bf16 %v562_v16, %v562_v16 }
 0xdbe   :  { %v634_v31 = vpop.permute.xlu1 %633 }
 0xdbf   :  { %1057 = vmatmul.mubr.msk.bf16.vlgmr.msra.gmra.mxu1 %vm36_vm0, %v563_v17 }
 0xdc0   :  { %1072 = vmatprep.mubr.msk.bf16.mxu1 %vm1199_vm1, %v1198_v0  ;;  %1069 = vmatpush3.bf16.msra.mxu1 %v1105_v1 }
 0xdc1   :  { %1070 = vmatprep.subr.bf16.mxu1 %v1198_v0 }
 0xdc4   :  { %1071 = vmatpush3.bf16.msra.mxu1 %v1106_v2 }
 0xe7f   :  { %v617_v19 = vpop.f32.mrf.mxu1 }
 0xe80   :  { %v623_v20 = vadd.f32 %v617_v19, %v561_v18 }
 0xe81   :  { %v1058_v21 = vpop.f32.mrf.mxu1 }
 0xe82   :  { %1149 = vtanh.f32 %v623_v20  ;;  %v972_v25 = vmul.f32 -1.442695, %v623_v20 }
 0xe83   :  { %v620_v22 = vpop.f32.mrf.mxu1 }
 0xe84   :  { %1151 = vpow2.f32 %v972_v25 }
 0xe85   :  { %v1059_v23 = vpop.f32.mrf.mxu1 }
 0xe8f   :  { %v1150_v24 = vpop.eup %1149 }
 0xe90   :  { %638 = vrot.lane.b32.xlu0 %v1150_v24, %s1200_s25 }
 0xe91   :  { %v1152_v26 = vpop.eup %1151 }
 0xe92   :  { %v627_v27 = vadd.f32 1.0, %v1152_v26 }
 0xe94   :  { %1153 = vrcp.f32 %v627_v27 }
 0xea1   :  { %v1154_v28 = vpop.eup %1153 }
 0xea2   :  { %v636_v32 = vmul.f32 %v1154_v28, %v634_v31 }
 0xf02   :  { %v639_v29 = vpop.permute.xlu0 %638 }
 0xf03   :  { %v641_v30 = vmul.f32 %v1154_v28, %v639_v29  ;;  %v1108_v29 = vld [vmem:[%s1407_s2] sm:$0xff]  }
 0xf05   :  { %643 = vrot.lane.b32.xlu0 %v641_v30, %s1200_s25 }
 0xf77   :  { %v644_v33 = vpop.permute.xlu0 %643 }
 0xf78   :  { %v646_v34 = vadd.f32 %v644_v33, %v636_v32 }
 0xf7a   :  { %1155 = vtanh.f32 %v646_v34 }
 0xf87   :  { %v1156_v35 = vpop.eup %1155 }
 0xf88   :  { %649 = vrot.lane.b32.xlu1 %v1156_v35, %s1200_s25 }
 0xf8c   :  { %659 = vrot.lane.b32.xlu1 %v646_v34, %s1201_s26 }
 0xffa   :  { %v650_v38 = vpop.permute.xlu1 %649 }
 0xffb   :  { %v652_v39 = vmul.f32 %v1154_v28, %v650_v38  ;;  %v1107_v28 = vld [vmem:[%s1407_s2 + $0x8] sm:$0xff]  }
 0xffd   :  { %654 = vrot.lane.b32.xlu0 %v652_v39, %s1196_s18 }
 0xffe   :  { %v660_v40 = vpop.permute.xlu1 %659 }
 0xfff   :  { %662 = vst.msk [vmem:[#allocation3] sm:$0xff] %vm36_vm0, %v660_v40 }
0x1006   :  { %v735_v41 = vld [vmem:[#allocation3] sm:$0xff] }
0x1007   :  { %737 = vrot.lane.b32.xlu1 %v735_v41, %s1200_s25 }
0x106f   :  { %v655_v42 = vpop.permute.xlu0 %654 }
0x1070   :  { %657 = vst.msk [vmem:[#allocation2] sm:$0xff] %vm36_vm0, %v655_v42 }
0x1077   :  { %v666_v43 = vld [vmem:[#allocation2] sm:$0xff] }
0x1078   :  { %v667_v44 = vpack.c.bf16 %v666_v43, %v666_v43 }
0x1079   :  { %v738_v59 = vpop.permute.xlu1 %737 }
0x107a   :  { %1065 = vmatmul.mubr.msk.bf16.vlgmr.msra.gmra.mxu0 %vm36_vm0, %v667_v44 }
0x107b   :  { %1080 = vmatprep.mubr.msk.bf16.mxu0 %vm1199_vm1, %v1198_v0  ;;  %1077 = vmatpush3.bf16.msra.mxu0 %v1107_v28 }
0x107c   :  { %1078 = vmatprep.subr.bf16.mxu0 %v1198_v0 }
0x107f   :  { %1079 = vmatpush3.bf16.msra.mxu0 %v1108_v29 }
0x113a   :  { %v721_v47 = vpop.f32.mrf.mxu0 }
0x113b   :  { %v727_v48 = vadd.f32 %v721_v47, %v665_v46 }
0x113c   :  { %v1066_v49 = vpop.f32.mrf.mxu0 }
0x113d   :  { %1157 = vtanh.f32 %v727_v48  ;;  %v976_v53 = vmul.f32 -1.442695, %v727_v48 }
0x113e   :  { %v724_v50 = vpop.f32.mrf.mxu0 }
0x113f   :  { %1159 = vpow2.f32 %v976_v53 }
0x1140   :  { %v1067_v51 = vpop.f32.mrf.mxu0 }
0x114a   :  { %v1158_v52 = vpop.eup %1157 }
0x114b   :  { %742 = vrot.lane.b32.xlu0 %v1158_v52, %s1200_s25 }
0x114c   :  { %v1160_v54 = vpop.eup %1159 }
0x114d   :  { %v731_v55 = vadd.f32 1.0, %v1160_v54 }
0x114f   :  { %1161 = vrcp.f32 %v731_v55 }
0x115c   :  { %v1162_v56 = vpop.eup %1161 }
0x115d   :  { %v740_v60 = vmul.f32 %v1162_v56, %v738_v59 }
0x11bd   :  { %v743_v57 = vpop.permute.xlu0 %742 }
0x11be   :  { %v745_v58 = vmul.f32 %v1162_v56, %v743_v57 }
0x11c0   :  { %747 = vrot.lane.b32.xlu0 %v745_v58, %s1200_s25 }
0x1232   :  { %v748_v61 = vpop.permute.xlu0 %747 }
0x1233   :  { %v750_v62 = vadd.f32 %v748_v61, %v740_v60 }
0x1235   :  { %1163 = vtanh.f32 %v750_v62 }
0x1242   :  { %v1164_v63 = vpop.eup %1163 }
0x1243   :  { %753 = vrot.lane.b32.xlu1 %v1164_v63, %s1200_s25 }
0x1247   :  { %763 = vrot.lane.b32.xlu1 %v750_v62, %s1201_s26 }
0x12b5   :  { %v754_v3 = vpop.permute.xlu1 %753 }
0x12b6   :  { %v756_v4 = vmul.f32 %v1162_v56, %v754_v3 }
0x12b8   :  { %758 = vrot.lane.b32.xlu0 %v756_v4, %s1196_s18 }
0x12b9   :  { %v764_v5 = vpop.permute.xlu1 %763 }
0x12ba   :  { %766 = vst.msk [vmem:[#allocation3] sm:$0xff] %vm36_vm0, %v764_v5 }
0x12c1   :  { %v839_v6 = vld [vmem:[#allocation3] sm:$0xff] }
0x12c2   :  { %841 = vrot.lane.b32.xlu1 %v839_v6, %s1200_s25 }
0x132a   :  { %v759_v7 = vpop.permute.xlu0 %758 }
0x132b   :  { %761 = vst.msk [vmem:[#allocation2] sm:$0xff] %vm36_vm0, %v759_v7 }
0x1332   :  { %v770_v8 = vld [vmem:[#allocation2] sm:$0xff] }
0x1333   :  { %v771_v9 = vpack.c.bf16 %v770_v8, %v770_v8 }
0x1334   :  { %v842_v23 = vpop.permute.xlu1 %841 }
0x1335   :  { %1073 = vmatmul.mubr.msk.bf16.vlgmr.msra.gmra.mxu1 %vm36_vm0, %v771_v9 }
0x13f5   :  { %v825_v11 = vpop.f32.mrf.mxu1 }
0x13f6   :  { %v831_v12 = vadd.f32 %v825_v11, %v769_v10 }
0x13f7   :  { %v1074_v13 = vpop.f32.mrf.mxu1 }
0x13f8   :  { %1165 = vtanh.f32 %v831_v12  ;;  %v980_v17 = vmul.f32 -1.442695, %v831_v12 }
0x13f9   :  { %v828_v14 = vpop.f32.mrf.mxu1 }
0x13fa   :  { %1167 = vpow2.f32 %v980_v17 }
0x13fb   :  { %v1075_v15 = vpop.f32.mrf.mxu1 }
0x1405   :  { %v1166_v16 = vpop.eup %1165 }
0x1406   :  { %846 = vrot.lane.b32.xlu0 %v1166_v16, %s1200_s25 }
0x1407   :  { %v1168_v18 = vpop.eup %1167 }
0x1408   :  { %v835_v19 = vadd.f32 1.0, %v1168_v18 }
0x140a   :  { %1169 = vrcp.f32 %v835_v19 }
0x1417   :  { %v1170_v20 = vpop.eup %1169 }
0x1418   :  { %v844_v24 = vmul.f32 %v1170_v20, %v842_v23 }
0x1478   :  { %v847_v21 = vpop.permute.xlu0 %846 }
0x1479   :  { %v849_v22 = vmul.f32 %v1170_v20, %v847_v21 }
0x147b   :  { %851 = vrot.lane.b32.xlu0 %v849_v22, %s1200_s25 }
0x14ed   :  { %v852_v25 = vpop.permute.xlu0 %851 }
0x14ee   :  { %v854_v26 = vadd.f32 %v852_v25, %v844_v24 }
0x14f0   :  { %1171 = vtanh.f32 %v854_v26 }
0x14fd   :  { %v1172_v27 = vpop.eup %1171 }
0x14fe   :  { %857 = vrot.lane.b32.xlu1 %v1172_v27, %s1200_s25 }
0x1502   :  { %867 = vrot.lane.b32.xlu1 %v854_v26, %s1201_s26 }
0x1570   :  { %v858_v30 = vpop.permute.xlu1 %857 }
0x1571   :  { %v860_v31 = vmul.f32 %v1170_v20, %v858_v30 }
0x1573   :  { %862 = vrot.lane.b32.xlu0 %v860_v31, %s1196_s18 }
0x1574   :  { %v868_v32 = vpop.permute.xlu1 %867 }
0x1575   :  { %870 = vst.msk [vmem:[#allocation3] sm:$0xff] %vm36_vm0, %v868_v32 }
0x15e5   :  { %v863_v33 = vpop.permute.xlu0 %862 }
0x15e6   :  { %865 = vst.msk [vmem:[#allocation2] sm:$0xff] %vm36_vm0, %v863_v33 }
0x15ed   :  { %v874_v34 = vld [vmem:[#allocation2] sm:$0xff] }
0x15ee   :  { %v875_v35 = vpack.c.bf16 %v874_v34, %v874_v34 }
0x15f0   :  { %1081 = vmatmul.mubr.msk.bf16.vlgmr.msra.gmra.mxu0 %vm36_vm0, %v875_v35 }
0x16b0   :  { %v936_v0 = vpop.f32.mrf.mxu0 }
0x16b1   :  { %v937_v37 = vadd.f32 %v981_v36, %v936_v0 }
0x16b2   :  { %v1082_v38 = vpop.f32.mrf.mxu0 }
0x16b3   :  { %943 = vst.msk [vmem:[%s1409_s4] sm:$0xff] %vm942_vm2, %v937_v37 }
0x16b4   :  { %v939_v39 = vpop.f32.mrf.mxu0 }
0x16b6   :  { %v1083_v40 = vpop.f32.mrf.mxu0 }
0x16b7   :  { %948 = vsyncpa [#allocation5], 1 }

</bundles_post_ra>
